<compile_context>
chip_gen: v6e
topology: v6e:2x2x1
jax: 0.10.0
libtpu: 0.0.40
codegen_flags: <defaults>
</compile_context>

<pallas_src>
import jax
import jax.numpy as jnp
from jax.experimental import pallas as pl
from jax.experimental.pallas import tpu as pltpu

H_DIM = 128  # hidden width fixed by the module


def latent_encoder_kernel(x_ref, y_ref, w1x_ref, w1y_ref, w_ref, b_ref, out_ref):
    H = H_DIM
    z2 = out_ref.shape[-1]          # 2 * z_dim
    z_dim = z2 // 2

    # Static 128-lane-aligned slices of the packed bias buffer (f32, [1, 640]).
    b1 = b_ref[:, 0:H]
    b2 = b_ref[:, H:2 * H]
    b3a = b_ref[:, 2 * H:3 * H]
    bh = b_ref[:, 3 * H:3 * H + z2]

    # Static 128-lane-aligned slices of the packed weight buffer (bf16, [128, 512]).
    # Cast back to f32 so all MXU/VPU work is plain f32 (bf16 only saved HBM bytes).
    w2 = w_ref[:, 0:H].astype(jnp.float32)
    w3a = w_ref[:, H:2 * H].astype(jnp.float32)
    wh = w_ref[:, 2 * H:2 * H + z2].astype(jnp.float32)
    w1x = w1x_ref[...].astype(jnp.float32)
    w1y = w1y_ref[...].astype(jnp.float32)

    # Layer 1: Linear(x_dim + y_dim, 128) realized as split-K, then ReLU.
    h = (jnp.dot(x_ref[...], w1x, preferred_element_type=jnp.float32)
         + jnp.dot(y_ref[...], w1y, preferred_element_type=jnp.float32)
         + b1)
    h = jnp.maximum(h, 0.0)

    # Layer 2: Linear(128, 128) + ReLU.
    h = jnp.dot(h, w2, preferred_element_type=jnp.float32) + b2
    h = jnp.maximum(h, 0.0)

    # Mean over context rows hoisted above the (linear-only) third layer, which is
    # folded offline with the aggregate Linear (w3a = w3 @ w_agg, padded 96->128).
    mean_h = jnp.mean(h, axis=0, keepdims=True)                       # [1, 128]
    a = jnp.dot(mean_h, w3a, preferred_element_type=jnp.float32) + b3a
    a = jnp.maximum(a, 0.0)                                           # [1, 128]

    # Fused loc/scale heads: one [1, 2*z] GEMV; two unmasked 128-lane stores.
    raw = jnp.dot(a, wh, preferred_element_type=jnp.float32) + bh     # [1, 2*z]
    out_ref[:, 0:z_dim] = raw[:, 0:z_dim]
    out_ref[:, z_dim:z2] = 0.1 + 0.9 * jax.nn.sigmoid(raw[:, z_dim:z2])


def pack_params(params, x_dim, h_dim=H_DIM):
    """Split w1, fold w3*w_agg (padded 96->128), fuse heads, pack buffers, cast bf16."""
    p = {k: jnp.asarray(v, jnp.float32) for k, v in params.items()}
    agg_dim = p["w_agg"].shape[1]          # 96
    z_dim = p["w_loc"].shape[1]

    # Split first Linear along K (feature-axis concat of x and y).
    w1x = p["w1"][:x_dim]
    w1y = p["w1"][x_dim:]

    # Fold layer-3 Linear into the aggregate Linear (no nonlinearity between them),
    # zero-padding the 96-wide aggregate dim to 128 lanes.
    w3a = jnp.zeros((h_dim, h_dim), jnp.float32)
    w3a = w3a.at[:, :agg_dim].set(p["w3"] @ p["w_agg"])
    b3a = jnp.zeros((1, h_dim), jnp.float32)
    b3a = b3a.at[:, :agg_dim].set(p["b3"] @ p["w_agg"] + p["b_agg"])

    # Fused loc/scale heads; padded agg lanes (96:128) are 0 after ReLU so the
    # zero rows of w_heads contribute nothing.
    w_heads = jnp.zeros((h_dim, 2 * z_dim), jnp.float32)
    w_heads = w_heads.at[:agg_dim, :z_dim].set(p["w_loc"])
    w_heads = w_heads.at[:agg_dim, z_dim:].set(p["w_scale"])
    b_heads = jnp.concatenate([p["b_loc"], p["b_scale"]], axis=-1)

    # One lane-concatenated weight buffer (bf16) and one bias buffer (f32).
    w_big = jnp.concatenate([p["w2"], w3a, w_heads], axis=-1).astype(jnp.bfloat16)
    b_big = jnp.concatenate([p["b1"], p["b2"], b3a, b_heads], axis=-1)

    return dict(w1x=w1x.astype(jnp.bfloat16), w1y=w1y.astype(jnp.bfloat16),
                w_big=w_big, b_big=b_big, z_dim=z_dim)


def latent_encoder_forward(x_context, y_context, packed):
    z_dim = packed["z_dim"]
    n_ctx, x_dim = x_context.shape
    y_dim = y_context.shape[1]

    args = (x_context.astype(jnp.float32), y_context.astype(jnp.float32),
            packed["w1x"], packed["w1y"], packed["w_big"], packed["b_big"])
    vmem = pl.BlockSpec(memory_space=pltpu.MemorySpace.VMEM)

    flops = 2 * (n_ctx * (x_dim + y_dim) * H_DIM        # layer 1 (split-K)
                 + n_ctx * H_DIM * H_DIM                 # layer 2
                 + H_DIM * H_DIM                         # folded w3*w_agg GEMV
                 + H_DIM * 2 * z_dim)                    # fused heads GEMV
    bytes_accessed = (sum(int(a.size) * a.dtype.itemsize for a in args)
                      + 2 * z_dim * 4)
    cost = pl.CostEstimate(flops=flops, transcendentals=z_dim,
                           bytes_accessed=bytes_accessed)

    out = pl.pallas_call(
        latent_encoder_kernel,
        out_shape=jax.ShapeDtypeStruct((1, 2 * z_dim), jnp.float32),
        in_specs=[vmem] * len(args),
        out_specs=vmem,
        cost_estimate=cost,
    )(*args)
    return out[0, :z_dim], out[0, z_dim:]


def init_linear(key, fan_in, fan_out):
    # deterministic, PyTorch-default-style init: U(-1/sqrt(fan_in), 1/sqrt(fan_in))
    kw, kb = jax.random.split(key)
    bound = 1.0 / (fan_in ** 0.5)
    w = jax.random.uniform(kw, (fan_in, fan_out), jnp.float32, -bound, bound)
    b = jax.random.uniform(kb, (1, fan_out), jnp.float32, -bound, bound)
    return w, b


def reference_forward(xc, yc, p):
    # straight transcription of the PyTorch forward (f32, no hoisting / fusion)
    d = jnp.concatenate([xc, yc], axis=-1)
    h = jax.nn.relu(d @ p["w1"] + p["b1"])
    h = jax.nn.relu(h @ p["w2"] + p["b2"])
    s_i = h @ p["w3"] + p["b3"]
    s_c = jnp.mean(s_i, axis=0, keepdims=True)
    s_c = jax.nn.relu(s_c @ p["w_agg"] + p["b_agg"])
    loc = (s_c @ p["w_loc"] + p["b_loc"])[0]
    scale = (0.1 + 0.9 * jax.nn.sigmoid(s_c @ p["w_scale"] + p["b_scale"]))[0]
    return loc, scale


if __name__ == "__main__":
    x_dim, y_dim = 8, 8
    h_dim, z_dim, agg_dim = 128, 128, 96   # z_dim == h_dim required by the forward pass
    n_ctx = 8

    key = jax.random.PRNGKey(0)
    k = jax.random.split(key, 8)
    w1, b1 = init_linear(k[0], x_dim + y_dim, h_dim)
    w2, b2 = init_linear(k[1], h_dim, h_dim)
    w3, b3 = init_linear(k[2], h_dim, z_dim)
    wa, ba = init_linear(k[3], h_dim, agg_dim)
    wl, bl = init_linear(k[4], agg_dim, z_dim)
    ws, bs = init_linear(k[5], agg_dim, z_dim)
    params = dict(w1=w1, b1=b1, w2=w2, b2=b2, w3=w3, b3=b3,
                  w_agg=wa, b_agg=ba, w_loc=wl, b_loc=bl,
                  w_scale=ws, b_scale=bs)

    x_context = jax.random.normal(k[6], (n_ctx, x_dim), jnp.float32)
    y_context = jax.random.normal(k[7], (n_ctx, y_dim), jnp.float32)

    packed = pack_params(params, x_dim)
    z_loc, z_scale = latent_encoder_forward(x_context, y_context, packed)
    jax.block_until_ready((z_loc, z_scale))

    loc_ref, scale_ref = reference_forward(x_context, y_context, params)
    assert z_loc.shape == (z_dim,) and z_scale.shape == (z_dim,)
    # bf16 weights -> looser tolerance than the pure-f32 version
    assert jnp.allclose(z_loc, loc_ref, atol=2e-2, rtol=2e-2)
    assert jnp.allclose(z_scale, scale_ref, atol=2e-2, rtol=2e-2)
    print("KERNEL_OK")
</pallas_src>

<mosaic_0001>
module attributes {stable_mosaic.version = 11 : i64} {
  func.func @latent_encoder_kernel(%arg0: memref<8x8xf32, #tpu.memory_space<vmem>>, %arg1: memref<8x8xf32, #tpu.memory_space<vmem>>, %arg2: memref<8x128xbf16, #tpu.memory_space<vmem>>, %arg3: memref<8x128xbf16, #tpu.memory_space<vmem>>, %arg4: memref<128x512xbf16, #tpu.memory_space<vmem>>, %arg5: memref<1x640xf32, #tpu.memory_space<vmem>>, %arg6: memref<1x256xf32, #tpu.memory_space<vmem>>) attributes {dimension_semantics = [], scalar_prefetch = 0 : i64, scratch_operands = 0 : i64, tpu.core_type = #tpu.core_type<tc>} {
    %c0 = arith.constant 0 : index
    %c0_0 = arith.constant 0 : index
    %0 = vector.load %arg5[%c0, %c0_0] : memref<1x640xf32, #tpu.memory_space<vmem>>, vector<1x128xf32>
    %c0_1 = arith.constant 0 : index
    %c128 = arith.constant 128 : index
    %1 = vector.load %arg5[%c0_1, %c128] : memref<1x640xf32, #tpu.memory_space<vmem>>, vector<1x128xf32>
    %c0_2 = arith.constant 0 : index
    %c256 = arith.constant 256 : index
    %2 = vector.load %arg5[%c0_2, %c256] : memref<1x640xf32, #tpu.memory_space<vmem>>, vector<1x128xf32>
    %c0_3 = arith.constant 0 : index
    %c384 = arith.constant 384 : index
    %3 = vector.load %arg5[%c0_3, %c384] : memref<1x640xf32, #tpu.memory_space<vmem>>, vector<1x256xf32>
    %c0_4 = arith.constant 0 : index
    %c0_5 = arith.constant 0 : index
    %4 = vector.load %arg4[%c0_4, %c0_5] : memref<128x512xbf16, #tpu.memory_space<vmem>>, vector<128x128xbf16>
    %5 = arith.extf %4 : vector<128x128xbf16> to vector<128x128xf32>
    %c0_6 = arith.constant 0 : index
    %c128_7 = arith.constant 128 : index
    %6 = vector.load %arg4[%c0_6, %c128_7] : memref<128x512xbf16, #tpu.memory_space<vmem>>, vector<128x128xbf16>
    %7 = arith.extf %6 : vector<128x128xbf16> to vector<128x128xf32>
    %c0_8 = arith.constant 0 : index
    %c256_9 = arith.constant 256 : index
    %8 = vector.load %arg4[%c0_8, %c256_9] : memref<128x512xbf16, #tpu.memory_space<vmem>>, vector<128x256xbf16>
    %9 = arith.extf %8 : vector<128x256xbf16> to vector<128x256xf32>
    %c0_10 = arith.constant 0 : index
    %c0_11 = arith.constant 0 : index
    %10 = vector.load %arg2[%c0_10, %c0_11] : memref<8x128xbf16, #tpu.memory_space<vmem>>, vector<8x128xbf16>
    %11 = arith.extf %10 : vector<8x128xbf16> to vector<8x128xf32>
    %c0_12 = arith.constant 0 : index
    %c0_13 = arith.constant 0 : index
    %12 = vector.load %arg3[%c0_12, %c0_13] : memref<8x128xbf16, #tpu.memory_space<vmem>>, vector<8x128xbf16>
    %13 = arith.extf %12 : vector<8x128xbf16> to vector<8x128xf32>
    %c0_14 = arith.constant 0 : index
    %c0_15 = arith.constant 0 : index
    %14 = vector.load %arg0[%c0_14, %c0_15] : memref<8x8xf32, #tpu.memory_space<vmem>>, vector<8x8xf32>
    %cst = arith.constant dense<0.000000e+00> : vector<8x128xf32>
    %15 = tpu.matmul %14, %11, %cst {dimension_numbers = #tpu.dot_dimension_numbers<[1], [0], [0], [1], [0, 0, 1, 1], [], []>} : vector<8x8xf32>, vector<8x128xf32>, vector<8x128xf32> -> vector<8x128xf32>
    %c0_16 = arith.constant 0 : index
    %c0_17 = arith.constant 0 : index
    %16 = vector.load %arg1[%c0_16, %c0_17] : memref<8x8xf32, #tpu.memory_space<vmem>>, vector<8x8xf32>
    %cst_18 = arith.constant dense<0.000000e+00> : vector<8x128xf32>
    %17 = tpu.matmul %16, %13, %cst_18 {dimension_numbers = #tpu.dot_dimension_numbers<[1], [0], [0], [1], [0, 0, 1, 1], [], []>} : vector<8x8xf32>, vector<8x128xf32>, vector<8x128xf32> -> vector<8x128xf32>
    %18 = arith.addf %15, %17 : vector<8x128xf32>
    %19 = vector.broadcast %0 : vector<1x128xf32> to vector<8x128xf32>
    %20 = arith.addf %18, %19 : vector<8x128xf32>
    %cst_19 = arith.constant 0.000000e+00 : f32
    %21 = vector.broadcast %cst_19 : f32 to vector<8x128xf32>
    %22 = arith.maximumf %20, %21 : vector<8x128xf32>
    %cst_20 = arith.constant dense<0.000000e+00> : vector<8x128xf32>
    %23 = tpu.matmul %22, %5, %cst_20 {dimension_numbers = #tpu.dot_dimension_numbers<[1], [0], [0], [1], [0, 0, 1, 1], [], []>} : vector<8x128xf32>, vector<128x128xf32>, vector<8x128xf32> -> vector<8x128xf32>
    %24 = vector.broadcast %1 : vector<1x128xf32> to vector<8x128xf32>
    %25 = arith.addf %23, %24 : vector<8x128xf32>
    %cst_21 = arith.constant 0.000000e+00 : f32
    %26 = vector.broadcast %cst_21 : f32 to vector<8x128xf32>
    %27 = arith.maximumf %25, %26 : vector<8x128xf32>
    %cst_22 = arith.constant dense<0.000000e+00> : vector<128xf32>
    %28 = vector.multi_reduction <add>, %27, %cst_22 [0] : vector<8x128xf32> to vector<128xf32>
    %29 = vector.shape_cast %28 : vector<128xf32> to vector<1x128xf32>
    %cst_23 = arith.constant 8.000000e+00 : f32
    %30 = vector.broadcast %cst_23 : f32 to vector<1x128xf32>
    %31 = arith.divf %29, %30 : vector<1x128xf32>
    %cst_24 = arith.constant dense<0.000000e+00> : vector<1x128xf32>
    %32 = tpu.matmul %31, %7, %cst_24 {dimension_numbers = #tpu.dot_dimension_numbers<[1], [0], [0], [1], [0, 0, 1, 1], [], []>} : vector<1x128xf32>, vector<128x128xf32>, vector<1x128xf32> -> vector<1x128xf32>
    %33 = arith.addf %32, %2 : vector<1x128xf32>
    %cst_25 = arith.constant 0.000000e+00 : f32
    %34 = vector.broadcast %cst_25 : f32 to vector<1x128xf32>
    %35 = arith.maximumf %33, %34 : vector<1x128xf32>
    %cst_26 = arith.constant dense<0.000000e+00> : vector<1x256xf32>
    %36 = tpu.matmul %35, %9, %cst_26 {dimension_numbers = #tpu.dot_dimension_numbers<[1], [0], [0], [1], [0, 0, 1, 1], [], []>} : vector<1x128xf32>, vector<128x256xf32>, vector<1x256xf32> -> vector<1x256xf32>
    %37 = arith.addf %36, %3 : vector<1x256xf32>
    %38 = vector.extract_strided_slice %37 {offsets = [0, 0], sizes = [1, 128], strides = [1, 1]} : vector<1x256xf32> to vector<1x128xf32>
    %c0_27 = arith.constant 0 : index
    %c0_28 = arith.constant 0 : index
    %39 = vector.load %arg6[%c0_27, %c0_28] : memref<1x256xf32, #tpu.memory_space<vmem>>, vector<1x128xf32>
    tpu.vector_store %arg6[%c0_27, %c0_28], %38 {strides = array<i32>} : memref<1x256xf32, #tpu.memory_space<vmem>>, vector<1x128xf32>,
    %40 = vector.extract_strided_slice %37 {offsets = [0, 128], sizes = [1, 128], strides = [1, 1]} : vector<1x256xf32> to vector<1x128xf32>
    %41 = arith.negf %40 : vector<1x128xf32>
    %42 = math.exp %41 : vector<1x128xf32>
    %cst_29 = arith.constant 1.000000e+00 : f32
    %43 = vector.broadcast %cst_29 : f32 to vector<1x128xf32>
    %44 = arith.addf %43, %42 : vector<1x128xf32>
    %45 = arith.divf %43, %44 : vector<1x128xf32>
    %cst_30 = arith.constant 0.899999976 : f32
    %46 = vector.broadcast %cst_30 : f32 to vector<1x128xf32>
    %47 = arith.mulf %46, %45 : vector<1x128xf32>
    %cst_31 = arith.constant 1.000000e-01 : f32
    %48 = vector.broadcast %cst_31 : f32 to vector<1x128xf32>
    %49 = arith.addf %48, %47 : vector<1x128xf32>
    %c0_32 = arith.constant 0 : index
    %c128_33 = arith.constant 128 : index
    %50 = vector.load %arg6[%c0_32, %c128_33] : memref<1x256xf32, #tpu.memory_space<vmem>>, vector<1x128xf32>
    tpu.vector_store %arg6[%c0_32, %c128_33], %49 {strides = array<i32>} : memref<1x256xf32, #tpu.memory_space<vmem>>, vector<1x128xf32>,
    return
  }
}

</mosaic_0001>

<bundles_post_ra>
// kernel: tpu_custom_call.1
= control target key start
LH: loop header
LB: loop body
LE: loop exit
PB: predicated region body
PF: predicated region fallthrough
CT: control target
= control target key end

     0   :  { %11 = vsyncpa [#allocation3], 0  ;;  %s1050_s0 = inlined_call_operand.hbm [shape: f32[8,8], index: 0, kind: input, shape index: {}]   ;;  %s1051_s1 = inlined_call_operand.hbm [shape: f32[8,8], index: 1, kind: input, shape index: {}]   ;;  %s1052_s2 = inlined_call_operand.hbm [shape: bf16[8,128], index: 2, kind: input, shape index: {}]   ;;  %s1053_s3 = inlined_call_operand.vmem [shape: bf16[8,128], index: 3, kind: input, shape index: {}]   ;;  %s1054_s4 = inlined_call_operand.hbm [shape: bf16[128,512], index: 4, kind: input, shape index: {}]   ;;  %s1055_s5 = inlined_call_operand.vmem [shape: f32[1,640], index: 5, kind: input, shape index: {}]   ;;  %s1056_s6 = inlined_call_operand.hbm [shape: f32[1,256], index: 6, kind: output, shape index: {}]  }
   0x1   :  { %12 = vsyncpa [#allocation6], 0 }
   0x2   :  { %13 = vsyncpa [#allocation9], 0 }
   0x3   :  { %14 = vsyncpa [#allocation4], 0  ;;  %s863_s21 = smov [#allocation5]   ;;  %s864_s23 = smov [#allocation2]  }
   0x4   :  { %s31_s22 = sshll.u32 %s863_s21, 4  ;;  %s21_s24 = sshll.u32 %s864_s23, 4  ;;  %s32_s22 = int_to_ptr.vmem [resolvable:$true] %s31_s22  ;;  %s22_s24 = int_to_ptr.vmem [resolvable:$true] %s21_s24 }
   0x5   :  { %s763_s25 = scalar_lea.vmem %s32_s22, 128  ;;  %p768_p1 = scmp.lt.s32.totalorder %s32_s22, %s32_s22 }
   0x6   :  { %p764_p0 = scmp.ne.s32.totalorder %s32_s22, %s763_s25  ;;  %p769_p2 = scmp.lt.s32.totalorder %s763_s25, %s763_s25 }
   0x8   :  { %p770_p3 = por %p769_p2, %p768_p1 }
   0xa   :  { %p771_p4 = pnand %p770_p3, %p764_p0 }
   0xc   :  { %774 = shalt.err (!%p771_p4)
}
   0xd   :  { %34 = dma.hbm_to_vmem [thread:$0]  %s1051_s1, 128, %s32_s22, [#allocation6]  }
   0xe   :  { %s783_s28 = scalar_lea.vmem %s22_s24, 128  ;;  %p788_p6 = scmp.lt.s32.totalorder %s22_s24, %s22_s24 }
   0xf   :  { %p784_p5 = scmp.ne.s32.totalorder %s22_s24, %s783_s28  ;;  %p789_p7 = scmp.lt.s32.totalorder %s783_s28, %s783_s28 }
  0x11   :  { %p790_p8 = por %p789_p7, %p788_p6 }
  0x13   :  { %p791_p9 = pnand %p790_p8, %p784_p5 }
  0x15   :  { %794 = shalt.err (!%p791_p9)
}
  0x16   :  { %24 = dma.hbm_to_vmem [thread:$0]  %s1050_s0, 128, %s22_s24, [#allocation3]  }
  0x17   :  { %s865_s7 = smov [#allocation7]   ;;  %s866_s9 = smov [#allocation8]  }
  0x18   :  { %s41_s8 = sshll.u32 %s865_s7, 4  ;;  %s52_s10 = sshll.u32 %s866_s9, 4  ;;  %s42_s8 = int_to_ptr.vmem [resolvable:$true] %s41_s8  ;;  %s53_s10 = int_to_ptr.vmem [resolvable:$true] %s52_s10 }
  0x19   :  { %s803_s11 = scalar_lea.vmem %s42_s8, 64  ;;  %p808_p11 = scmp.lt.s32.totalorder %s42_s8, %s42_s8 }
  0x1a   :  { %p804_p10 = scmp.ne.s32.totalorder %s42_s8, %s803_s11  ;;  %p809_p12 = scmp.lt.s32.totalorder %s803_s11, %s803_s11 }
  0x1c   :  { %p810_p13 = por %p809_p12, %p808_p11 }
  0x1e   :  { %p811_p0 = pnand %p810_p13, %p804_p10 }
  0x20   :  { %814 = shalt.err (!%p811_p0)
}
  0x21   :  { %44 = dma.hbm_to_vmem [thread:$0]  %s1052_s2, 64, %s42_s8, [#allocation6]  }
  0x22   :  { %s823_s13 = scalar_lea.vmem %s53_s10, 4096  ;;  %p828_p2 = scmp.lt.s32.totalorder %s53_s10, %s53_s10 }
  0x23   :  { %p824_p1 = scmp.ne.s32.totalorder %s53_s10, %s823_s13  ;;  %p829_p3 = scmp.lt.s32.totalorder %s823_s13, %s823_s13 }
  0x25   :  { %p830_p4 = por %p829_p3, %p828_p2 }
  0x27   :  { %p831_p5 = pnand %p830_p4, %p824_p1 }
  0x29   :  { %834 = shalt.err (!%p831_p5)
}
  0x2a   :  { %s867_s0 = smov 256   ;;  %s868_s14 = smov 16  }
  0x2b   :  { %58 = dma.hbm_to_vmem [thread:$0]  %s1054_s4, 4096, %s53_s10, [#allocation9], %s867_s0, %s867_s0, %s868_s14  }
  0x2c   :  { %855 = dma.done.wait [#allocation3], 128  }
  0x2d   :  { %856 = vsyncadd [#allocation3], 4294967168 }
  0x2e   :  { %857 = dma.done.wait [#allocation6], 192  }
  0x2f   :  { %858 = vsyncadd [#allocation6], 4294967104 }
  0x30   :  { %859 = dma.done.wait [#allocation9], 4096  }
  0x31   :  { %860 = vsyncadd [#allocation9], 4294963200  ;;  %v869_v0 = vmov 0.0   ;;  %vm870_vm0 = vmmov 0   ;;  %v191_v1 = vld [vmem:[%s1053_s3] sm:$0xf] }
  0x32   :  { %662 = vmatprep.subr.mxu1 %v869_v0  ;;  %664 = vmatprep.mubr.msk.f32.mxu1 %vm870_vm0, %v869_v0  ;;  %v189_v2 = vld [vmem:[#allocation7] sm:$0xf]  ;;  %v192_v3 = vunpack.c.l.bf16 %v191_v1  ;;  %v194_v4 = vld [vmem:[#allocation5] sm:$0xff]  ;;  %vm195_vm1 = vcmask 64512   ;;  %v930_v7 = vld [vmem:[#allocation8 + $0xe0] sm:$0xff]  }
  0x33   :  { %672 = vmatprep.subr.mxu0 %v869_v0  ;;  %704 = vmatprep.mubr.msk.f32.mxu0 %vm870_vm0, %v869_v0  ;;  %v190_v5 = vunpack.c.l.bf16 %v189_v2  ;;  %v928_v6 = vld [vmem:[#allocation8 + $0xf0] sm:$0xff]   ;;  %v107_v10 = vunpack.c.l.bf16 %v930_v7  ;;  %v940_v12 = vld [vmem:[#allocation8 + $0xc0] sm:$0xff]   ;;  %v139_v40 = vunpack.c.h.bf16 %v930_v7  ;;  %v621_v47 = vld [vmem:[%s1055_s5] ss:$0 sm:$0xff] }
  0x34   :  { %v108_v8 = vunpack.c.l.bf16 %v928_v6  ;;  %663 = vmatpush3.msra.mxu1 %v192_v3  ;;  %v933_v9 = vld [vmem:[#allocation8 + $0xd0] sm:$0xff]   ;;  %v105_v15 = vunpack.c.l.bf16 %v940_v12  ;;  %v950_v16 = vld [vmem:[#allocation8 + $0xa0] sm:$0xff]   ;;  %v140_v39 = vunpack.c.h.bf16 %v928_v6  ;;  %v137_v42 = vunpack.c.h.bf16 %v940_v12  ;;  %v156_v63 = vld [vmem:[#allocation8 + $0xf8] sm:$0xff] }
  0x35   :  { %665 = vmatmul.mubr.msk.f32.vlgmr.msra.gmra.mxu1 %vm195_vm1, %v194_v4  ;;  %667 = vmatprep.subr.mxu1 %v869_v0  ;;  %v193_v11 = vld [vmem:[#allocation2] sm:$0xff]  ;;  %v106_v13 = vunpack.c.l.bf16 %v933_v9  ;;  %v103_v19 = vunpack.c.l.bf16 %v950_v16  ;;  %v960_v20 = vld [vmem:[#allocation8 + $0x80] sm:$0xff]   ;;  %v138_v41 = vunpack.c.h.bf16 %v933_v9  ;;  %v135_v44 = vunpack.c.h.bf16 %v950_v16  ;;  %v154_v2 = vld [vmem:[#allocation8 + $0xd8] sm:$0xff] }
  0x36   :  { %668 = vmatpush3.msra.mxu1 %v190_v5  ;;  %669 = vmatprep.mubr.msk.f32.mxu1 %vm870_vm0, %v869_v0  ;;  %v945_v14 = vld [vmem:[#allocation8 + $0xb0] sm:$0xff]   ;;  %v101_v23 = vunpack.c.l.bf16 %v960_v20  ;;  %v968_v24 = vld [vmem:[#allocation8 + $0x60] sm:$0xff]   ;;  %v133_v54 = vunpack.c.h.bf16 %v960_v20  ;;  %v155_v1 = vld [vmem:[#allocation8 + $0xe8] sm:$0xff]  ;;  %v187_v3 = vunpack.c.l.bf16 %v156_v63  ;;  %v188_v4 = vunpack.c.h.bf16 %v156_v63 }
  0x37   :  { %673 = vmatpush3.msra.mxu0 %v108_v8  ;;  %707 = vmatprep.subr.mxu1 %v869_v0  ;;  %v104_v17 = vunpack.c.l.bf16 %v945_v14  ;;  %v956_v18 = vld [vmem:[#allocation8 + $0x90] sm:$0xff]   ;;  %v99_v26 = vunpack.c.l.bf16 %v968_v24  ;;  %v979_v29 = vld [vmem:[#allocation8 + $0x40] sm:$0xff]   ;;  %v136_v43 = vunpack.c.h.bf16 %v945_v14  ;;  %v131_v56 = vunpack.c.h.bf16 %v968_v24  ;;  %v153_v7 = vld [vmem:[#allocation8 + $0xc8] sm:$0xff] }
  0x38   :  { %674 = vmatprep.subr.mxu0 %v869_v0  ;;  %v102_v21 = vunpack.c.l.bf16 %v956_v18  ;;  %v964_v22 = vld [vmem:[#allocation8 + $0x70] sm:$0xff]   ;;  %v97_v30 = vunpack.c.l.bf16 %v979_v29  ;;  %v987_v33 = vld [vmem:[#allocation8 + $0x20] sm:$0xff]   ;;  %v134_v53 = vunpack.c.h.bf16 %v956_v18  ;;  %v129_v58 = vunpack.c.h.bf16 %v979_v29  ;;  %v149_v18 = vld [vmem:[#allocation8 + $0x88] sm:$0xff] }
  0x39   :  { %670 = vmatmul.mubr.msk.f32.vlgmr.msra.gmra.mxu1 %vm195_vm1, %v193_v11  ;;  %675 = vmatpush3.msra.mxu0 %v107_v10  ;;  %v100_v25 = vunpack.c.l.bf16 %v964_v22  ;;  %v976_v27 = vld [vmem:[#allocation8 + $0x50] sm:$0xff]   ;;  %v95_v34 = vunpack.c.l.bf16 %v987_v33  ;;  %v77_v37 = vld [vmem:[#allocation8] sm:$0xff]   ;;  %v132_v55 = vunpack.c.h.bf16 %v964_v22  ;;  %v127_v60 = vunpack.c.h.bf16 %v987_v33  ;;  %v152_v10 = vld [vmem:[#allocation8 + $0xb8] sm:$0xff] }
  0x3a   :  { %676 = vmatprep.subr.mxu0 %v869_v0  ;;  %739 = vmatprep.mubr.msk.f32.mxu1 %vm870_vm0, %v869_v0  ;;  %v98_v28 = vunpack.c.l.bf16 %v976_v27  ;;  %v983_v31 = vld [vmem:[#allocation8 + $0x30] sm:$0xff]   ;;  %v93_v38 = vunpack.c.l.bf16 %v77_v37  ;;  %v130_v57 = vunpack.c.h.bf16 %v976_v27  ;;  %v125_v62 = vunpack.c.h.bf16 %v77_v37  ;;  %v147_v24 = vld [vmem:[#allocation8 + $0x68] sm:$0xff]  ;;  %v146_v27 = vld [vmem:[#allocation8 + $0x58] sm:$0xff] }
  0x3b   :  { %677 = vmatpush3.msra.mxu0 %v106_v13  ;;  %v96_v32 = vunpack.c.l.bf16 %v983_v31  ;;  %v991_v35 = vld [vmem:[#allocation8 + $0x10] sm:$0xff]   ;;  %708 = vmatpush3.msra.mxu1 %v140_v39  ;;  %v128_v59 = vunpack.c.h.bf16 %v983_v31  ;;  %v186_v5 = vunpack.c.h.bf16 %v155_v1  ;;  %v185_v6 = vunpack.c.l.bf16 %v155_v1  ;;  %v151_v13 = vld [vmem:[#allocation8 + $0xa8] sm:$0xff]  ;;  %v144_v33 = vld [vmem:[#allocation8 + $0x38] sm:$0xff] }
  0x3c   :  { %678 = vmatprep.subr.mxu0 %v869_v0  ;;  %v94_v36 = vunpack.c.l.bf16 %v991_v35  ;;  %709 = vmatprep.subr.mxu1 %v869_v0  ;;  %v126_v61 = vunpack.c.h.bf16 %v991_v35  ;;  %v184_v8 = vunpack.c.h.bf16 %v154_v2  ;;  %v183_v9 = vunpack.c.l.bf16 %v154_v2 }
  0x3d   :  { %679 = vmatpush3.msra.mxu0 %v105_v15  ;;  %710 = vmatpush3.msra.mxu1 %v139_v40  ;;  %v182_v11 = vunpack.c.h.bf16 %v153_v7  ;;  %v181_v12 = vunpack.c.l.bf16 %v153_v7  ;;  %v179_v14 = vunpack.c.l.bf16 %v152_v10  ;;  %v150_v15 = vld [vmem:[#allocation8 + $0x98] sm:$0xff]  ;;  %v178_v16 = vunpack.c.h.bf16 %v151_v13 }
  0x3e   :  { %680 = vmatprep.subr.mxu0 %v869_v0  ;;  %711 = vmatprep.subr.mxu1 %v869_v0  ;;  %v175_v20 = vunpack.c.l.bf16 %v150_v15  ;;  %v174_v22 = vunpack.c.h.bf16 %v149_v18  ;;  %v169_v29 = vunpack.c.l.bf16 %v147_v24  ;;  %v168_v31 = vunpack.c.h.bf16 %v146_v27 }
  0x3f   :  { %681 = vmatpush3.msra.mxu0 %v104_v17  ;;  %712 = vmatpush3.msra.mxu1 %v138_v41  ;;  %v177_v17 = vunpack.c.l.bf16 %v151_v13  ;;  %v164_v37 = vunpack.c.h.bf16 %v144_v33  ;;  %v622_v41 = vld [vmem:[%s1055_s5 + $0x1] ss:$0 sm:$0xff]  ;;  %v507_v1 = vlaneseq }
  0x40   :  { %682 = vmatprep.subr.mxu0 %v869_v0  ;;  %713 = vmatprep.subr.mxu1 %v869_v0 }
  0x41   :  { %683 = vmatpush3.msra.mxu0 %v103_v19  ;;  %714 = vmatpush3.msra.mxu1 %v137_v42  ;;  %v176_v19 = vunpack.c.h.bf16 %v150_v15  ;;  %v508_v2 = vshrl.u32 %v507_v1, 7  ;;  %vm1039_vm2 = vcmp.lt.s32.totalorder %v507_v1, 128 }
  0x42   :  { %684 = vmatprep.subr.mxu0 %v869_v0  ;;  %715 = vmatprep.subr.mxu1 %v869_v0 }
  0x43   :  { %685 = vmatpush3.msra.mxu0 %v102_v21  ;;  %716 = vmatpush3.msra.mxu1 %v136_v43  ;;  %v148_v21 = vld [vmem:[#allocation8 + $0x78] sm:$0xff] }
  0x44   :  { %686 = vmatprep.subr.mxu0 %v869_v0  ;;  %717 = vmatprep.subr.mxu1 %v869_v0 }
  0x45   :  { %687 = vmatpush3.msra.mxu0 %v101_v23  ;;  %718 = vmatpush3.msra.mxu1 %v135_v44  ;;  %v173_v23 = vunpack.c.l.bf16 %v149_v18 }
  0x46   :  { %688 = vmatprep.subr.mxu0 %v869_v0  ;;  %719 = vmatprep.subr.mxu1 %v869_v0 }
  0x47   :  { %689 = vmatpush3.msra.mxu0 %v100_v25  ;;  %720 = vmatpush3.msra.mxu1 %v134_v53  ;;  %v172_v25 = vunpack.c.h.bf16 %v148_v21  ;;  %v142_v53 = vld [vmem:[#allocation8 + $0x18] sm:$0xff] }
  0x48   :  { %690 = vmatprep.subr.mxu0 %v869_v0  ;;  %721 = vmatprep.subr.mxu1 %v869_v0 }
  0x49   :  { %691 = vmatpush3.msra.mxu0 %v99_v26  ;;  %722 = vmatpush3.msra.mxu1 %v133_v54  ;;  %v171_v26 = vunpack.c.l.bf16 %v148_v21  ;;  %v160_v54 = vunpack.c.h.bf16 %v142_v53 }
  0x4a   :  { %692 = vmatprep.subr.mxu0 %v869_v0  ;;  %723 = vmatprep.subr.mxu1 %v869_v0 }
  0x4b   :  { %693 = vmatpush3.msra.mxu0 %v98_v28  ;;  %724 = vmatpush3.msra.mxu1 %v132_v55  ;;  %v170_v28 = vunpack.c.h.bf16 %v147_v24  ;;  %v159_v55 = vunpack.c.l.bf16 %v142_v53 }
  0x4c   :  { %694 = vmatprep.subr.mxu0 %v869_v0  ;;  %725 = vmatprep.subr.mxu1 %v869_v0 }
  0x4d   :  { %695 = vmatpush3.msra.mxu0 %v97_v30  ;;  %726 = vmatpush3.msra.mxu1 %v131_v56  ;;  %v145_v30 = vld [vmem:[#allocation8 + $0x48] sm:$0xff] }
  0x4e   :  { %696 = vmatprep.subr.mxu0 %v869_v0  ;;  %727 = vmatprep.subr.mxu1 %v869_v0  ;;  %v165_v35 = vunpack.c.l.bf16 %v145_v30  ;;  %v141_v56 = vld [vmem:[#allocation8 + $0x8] sm:$0xff] }
  0x4f   :  { %697 = vmatpush3.msra.mxu0 %v96_v32  ;;  %728 = vmatpush3.msra.mxu1 %v130_v57  ;;  %v167_v32 = vunpack.c.l.bf16 %v146_v27  ;;  %v158_v57 = vunpack.c.h.bf16 %v141_v56 }
  0x50   :  { %698 = vmatprep.subr.mxu0 %v869_v0  ;;  %729 = vmatprep.subr.mxu1 %v869_v0 }
  0x51   :  { %699 = vmatpush3.msra.mxu0 %v95_v34  ;;  %730 = vmatpush3.msra.mxu1 %v129_v58  ;;  %v166_v34 = vunpack.c.h.bf16 %v145_v30  ;;  %v157_v58 = vunpack.c.l.bf16 %v141_v56 }
  0x52   :  { %700 = vmatprep.subr.mxu0 %v869_v0  ;;  %731 = vmatprep.subr.mxu1 %v869_v0 }
  0x53   :  { %701 = vmatpush3.msra.mxu0 %v94_v36  ;;  %732 = vmatpush3.msra.mxu1 %v128_v59  ;;  %v143_v36 = vld [vmem:[#allocation8 + $0x28] sm:$0xff] }
  0x54   :  { %702 = vmatprep.subr.mxu0 %v869_v0  ;;  %733 = vmatprep.subr.mxu1 %v869_v0  ;;  %v162_v39 = vunpack.c.h.bf16 %v143_v36  ;;  %v161_v40 = vunpack.c.l.bf16 %v143_v36  ;;  %v75_v59 = vld [vmem:[%s1055_s5 + $0x2] sm:$0x1] }
  0x55   :  { %703 = vmatpush3.msra.mxu0 %v93_v38  ;;  %734 = vmatpush3.msra.mxu1 %v127_v60  ;;  %v163_v38 = vunpack.c.l.bf16 %v144_v33 }
  0x56   :  { %735 = vmatprep.subr.mxu1 %v869_v0  ;;  %517 = vmatprep.subr.mxu0 %v188_v4  ;;  %v76_v4 = vld [vmem:[%s1055_s5 + $0x3] sm:$0x3]  ;;  %s871_s5 = smov [#allocation10]  }
  0x57   :  { %736 = vmatpush3.msra.mxu1 %v126_v61  ;;  %s608_s24 = sshll.u32 %s871_s5, 4  ;;  %s609_s24 = int_to_ptr.vmem [resolvable:$true] %s608_s24 }
  0x58   :  { %737 = vmatprep.subr.mxu1 %v869_v0  ;;  %s835_s25 = scalar_lea.vmem %s609_s24, 32  ;;  %p840_p7 = scmp.lt.s32.totalorder %s609_s24, %s609_s24 }
  0x59   :  { %738 = vmatpush3.msra.mxu1 %v125_v62  ;;  %p836_p6 = scmp.ne.s32.totalorder %s609_s24, %s835_s25  ;;  %p841_p8 = scmp.lt.s32.totalorder %s835_s25, %s835_s25 }
  0x5b   :  { %p842_p9 = por %p841_p8, %p840_p7 }
  0x5d   :  { %p843_p10 = pnand %p842_p9, %p836_p6 }
  0xf5   :  { %v265_v45 = vpop.f32.mrf.mxu1 }
  0xf7   :  { %v666_v46 = vpop.f32.mrf.mxu1 }
  0xf9   :  { %v338_v48 = vpop.f32.mrf.mxu1 }
  0xfa   :  { %v339_v49 = vadd.f32 %v338_v48, %v265_v45 }
  0xfb   :  { %v671_v50 = vpop.f32.mrf.mxu1 }
  0xfc   :  { %v348_v51 = vadd.f32 %v621_v47, %v339_v49 }
  0xfe   :  { %v349_v52 = vmax.f32 %v348_v51, 0.0 }
 0x100   :  { %705 = vmatmul.mubr.f32.vlgmr.msra.gmra.mxu0 %v349_v52 }
 0x101   :  { %581 = vmatprep.mubr.f32.mxu0 %v869_v0  ;;  %518 = vmatpush1.msra.mxu0 %v187_v3  ;;  %v180_v0 = vunpack.c.h.bf16 %v152_v10  ;;  %v509_v3 = vsub.s32 0, %v508_v2 }
 0x102   :  { %519 = vmatprep.subr.mxu0 %v186_v5  ;;  %v513_v5 = vsub.s32 1, %v508_v2 }
 0x103   :  { %520 = vmatpush1.msra.mxu0 %v185_v6  ;;  %v510_v6 = vrot.slane %v76_v4, %v509_v3 }
 0x104   :  { %521 = vmatprep.subr.mxu0 %v184_v8  ;;  %v514_v7 = vrot.slane %v76_v4, %v513_v5 }
 0x105   :  { %522 = vmatpush1.msra.mxu0 %v183_v9 }
 0x106   :  { %523 = vmatprep.subr.mxu0 %v182_v11 }
 0x107   :  { %524 = vmatpush1.msra.mxu0 %v181_v12 }
 0x108   :  { %525 = vmatprep.subr.mxu0 %v180_v0 }
 0x109   :  { %526 = vmatpush1.msra.mxu0 %v179_v14 }
 0x10a   :  { %527 = vmatprep.subr.mxu0 %v178_v16 }
 0x10b   :  { %528 = vmatpush1.msra.mxu0 %v177_v17 }
 0x10c   :  { %529 = vmatprep.subr.mxu0 %v176_v19 }
 0x10d   :  { %530 = vmatpush1.msra.mxu0 %v175_v20 }
 0x10e   :  { %531 = vmatprep.subr.mxu0 %v174_v22 }
 0x10f   :  { %532 = vmatpush1.msra.mxu0 %v173_v23 }
 0x110   :  { %533 = vmatprep.subr.mxu0 %v172_v25 }
 0x111   :  { %534 = vmatpush1.msra.mxu0 %v171_v26 }
 0x112   :  { %535 = vmatprep.subr.mxu0 %v170_v28 }
 0x113   :  { %536 = vmatpush1.msra.mxu0 %v169_v29 }
 0x114   :  { %537 = vmatprep.subr.mxu0 %v168_v31 }
 0x115   :  { %538 = vmatpush1.msra.mxu0 %v167_v32 }
 0x116   :  { %539 = vmatprep.subr.mxu0 %v166_v34 }
 0x117   :  { %540 = vmatpush1.msra.mxu0 %v165_v35 }
 0x118   :  { %541 = vmatprep.subr.mxu0 %v164_v37 }
 0x119   :  { %542 = vmatpush1.msra.mxu0 %v163_v38 }
 0x11a   :  { %543 = vmatprep.subr.mxu0 %v162_v39 }
 0x11b   :  { %544 = vmatpush1.msra.mxu0 %v161_v40 }
 0x11c   :  { %545 = vmatprep.subr.mxu0 %v160_v54 }
 0x11d   :  { %546 = vmatpush1.msra.mxu0 %v159_v55 }
 0x11e   :  { %547 = vmatprep.subr.mxu0 %v158_v57 }
 0x11f   :  { %548 = vmatpush1.msra.mxu0 %v157_v58 }
 0x1c0   :  { %v422_v42 = vpop.f32.mrf.mxu0 }
 0x1c1   :  { %v423_v43 = vadd.f32 %v622_v41, %v422_v42 }
 0x1c2   :  { %v706_v44 = vpop.f32.mrf.mxu0 }
 0x1c3   :  { %v426_v45 = vmax.f32 %v423_v43, 0.0 }
 0x1c5   :  { %v427_v46 = vrot.slane %v426_v45, 4 }
 0x1c7   :  { %v428_v47 = vadd.f32 %v427_v46, %v426_v45 }
 0x1c9   :  { %v429_v48 = vrot.slane %v428_v47, 2 }
 0x1cb   :  { %v430_v49 = vadd.f32 %v429_v48, %v428_v47 }
 0x1cd   :  { %v431_v50 = vrot.slane %v430_v49, 1 }
 0x1cf   :  { %v432_v51 = vadd.f32 %v431_v50, %v430_v49 }
 0x1d1   :  { %v434_v52 = vmul.f32 0.125, %v432_v51 }
 0x1d3   :  { %740 = vmatmul.mubr.f32.vlgmr.msra.gmra.mxu1 %v434_v52 }
 0x293   :  { %v501_v60 = vpop.f32.mrf.mxu1 }
 0x294   :  { %v502_v61 = vadd.f32 %v501_v60, %v75_v59 }
 0x295   :  { %v741_v62 = vpop.f32.mrf.mxu1 }
 0x296   :  { %v505_v63 = vmax.f32 %v502_v61, 0.0 }
 0x298   :  { %582 = vmatmul.mubr.f32.vlgmr.msra.gmra.mxu0 %v505_v63 }
 0x358   :  { %v583_v8 = vpop.f32.mrf.mxu0 }
 0x359   :  { %v584_v10 = vadd.f32 %v583_v8, %v510_v6 }
 0x35a   :  { %v585_v11 = vpop.f32.mrf.mxu0 }
 0x35b   :  { %v586_v12 = vadd.f32 %v585_v11, %v514_v7  ;;  %592 = vst.msk [vmem:[#allocation10] sm:$0x1] %vm1039_vm2, %v584_v10 }
 0x35d   :  { %v623_v13 = vmul.f32 -1.442695, %v586_v12 }
 0x35f   :  { %751 = vpow2.f32 %v623_v13 }
 0x36c   :  { %v752_v0 = vpop.eup %751 }
 0x36d   :  { %v596_v14 = vadd.f32 1.0, %v752_v0 }
 0x36f   :  { %753 = vrcp.f32 %v596_v14 }
 0x37c   :  { %v754_v15 = vpop.eup %753 }
 0x37d   :  { %v599_v16 = vmul.f32 0.9, %v754_v15 }
 0x37f   :  { %v600_v17 = vadd.f32 0.1, %v599_v16 }
 0x381   :  { %601 = vst.msk [vmem:[#allocation10 + $0x1] sm:$0x1] %vm1039_vm2, %v600_v17 }
 0x382   :  { %846 = shalt.err (!%p843_p10)
}
 0x383   :  { %611 = dma.vmem_to_hbm [thread:$0]  %s609_s24, 32, %s1056_s6, [#allocation4]  }
 0x384   :  { %861 = dma.done.wait [#allocation4], 32  }
 0x385   :  { %862 = vsyncadd [#allocation4], 4294967264 }
 0x386   :  { %615 = vsyncpa [#allocation3], 1 }
 0x387   :  { %616 = vsyncpa [#allocation6], 1 }
 0x388   :  { %617 = vsyncpa [#allocation9], 1 }
 0x389   :  { %618 = vsyncpa [#allocation4], 1 }

</bundles_post_ra>
